<compile_context>
chip_gen: v7x
topology: tpu7x:2x2x1
jax: 0.10.0
libtpu: 0.0.40
codegen_flags: <defaults>
</compile_context>

<pallas_src>
import functools
import itertools

import numpy as np
import jax
import jax.numpy as jnp
from jax.experimental import pallas as pl
from jax.experimental.pallas import tpu as pltpu

try:  # scipy is what the reference uses; fall back to exact brute force if unavailable
    from scipy.optimize import linear_sum_assignment as _scipy_lsa
except Exception:  # pragma: no cover
    _scipy_lsa = None

# Matcher weights (module __init__ defaults).
COST_CLASS = 2.0
COST_PARAM = 1.0
COST_CENTER = 2.0
COST_EMB = 0.5


def _round_up(x, m):
    return ((x + m - 1) // m) * m


def _cost_kernel(pred_ref, tgt_ref, c_ref, *, nc, pd, cd, ed,
                 w_class, w_param, w_center, w_emb):
    """One batch element: C[q, t] = w_p*L1(param) + w_c*(-prob[tgt]) + w_ctr*L2(center)
    + w_e*L2(emb).  pred_ref: [nq, F], tgt_ref: [F, T_pad], c_ref: [nq, T_pad]."""
    # Static feature offsets in the fused layout [class | param | center | emb].
    o1 = nc
    o2 = nc + pd
    o3 = nc + pd + cd
    o4 = nc + pd + cd + ed

    logits = pred_ref[:, 0:o1]          # [nq, nc]
    param = pred_ref[:, o1:o2]          # [nq, pd]
    center = pred_ref[:, o2:o3]         # [nq, cd]
    emb = pred_ref[:, o3:o4]            # [nq, ed]

    onehot_t = tgt_ref[0:o1, :]         # [nc, T]
    tparam_t = tgt_ref[o1:o2, :]        # [pd, T]
    tcenter_t = tgt_ref[o2:o3, :]       # [cd, T]
    temb_t = tgt_ref[o3:o4, :]          # [ed, T]

    # Softmax over classes (last dim of [nq, nc]).
    m = jnp.max(logits, axis=-1, keepdims=True)
    e = jnp.exp(logits - m)
    prob = e / jnp.sum(e, axis=-1, keepdims=True)

    # cost_class = -prob[:, tgt_ids]  as a one-hot gather on the MXU.
    # bf16 operands (one-hot is exact in bf16), f32 accumulation.
    acc = (-w_class) * jnp.dot(prob.astype(jnp.bfloat16),
                               onehot_t.astype(jnp.bfloat16),
                               preferred_element_type=jnp.float32)

    # cost_emb = cdist(emb, tgt_emb, p=2) via the Gram identity on the MXU:
    #   ||x-y||^2 = ||x||^2 + ||y||^2 - 2 x.y   (clamped before sqrt).
    emb_sq = jnp.sum(emb * emb, axis=-1, keepdims=True)            # [nq, 1]  (f32)
    temb_sq = jnp.sum(temb_t * temb_t, axis=0, keepdims=True)      # [1, T]   (f32)
    gram = jnp.dot(emb.astype(jnp.bfloat16), temb_t.astype(jnp.bfloat16),
                   preferred_element_type=jnp.float32)             # [nq, T]
    sq_e = jnp.maximum(emb_sq + temb_sq - 2.0 * gram, 0.0)
    acc = acc + w_emb * jnp.sqrt(sq_e)

    # cost_center = cdist(center, tgt_center, p=2).  cd == 2: keep elementwise/exact
    # (Gram rewrite buys nothing on the VALU at D=2 and adds cancellation error near
    #  coincident centers).
    sq_c = jnp.zeros_like(acc)
    for d in range(cd):
        diff = center[:, d:d + 1] - tcenter_t[d:d + 1, :]
        sq_c = sq_c + diff * diff
    acc = acc + w_center * jnp.sqrt(sq_c)

    # cost_param = cdist(param, tgt_param, p=1).  No MXU formulation; D=3 elementwise,
    # folded straight into the single accumulator.
    for d in range(pd):
        acc = acc + w_param * jnp.abs(param[:, d:d + 1] - tparam_t[d:d + 1, :])

    c_ref[...] = acc


def compute_cost_matrix(pred_feat, tgt_feat_t, *, nc, pd, cd, ed,
                        w_class=COST_CLASS, w_param=COST_PARAM,
                        w_center=COST_CENTER, w_emb=COST_EMB):
    bs, nq, f = pred_feat.shape
    _, _, t_pad = tgt_feat_t.shape
    kernel = functools.partial(_cost_kernel, nc=nc, pd=pd, cd=cd, ed=ed,
                               w_class=float(w_class), w_param=float(w_param),
                               w_center=float(w_center), w_emb=float(w_emb))
    return pl.pallas_call(
        kernel,
        out_shape=jax.ShapeDtypeStruct((bs, nq, t_pad), jnp.float32),
        grid=(bs,),
        in_specs=[
            pl.BlockSpec((None, nq, f), lambda b: (b, 0, 0)),       # predictions, per batch
            pl.BlockSpec((None, f, t_pad), lambda b: (b, 0, 0)),    # transposed targets
        ],
        out_specs=pl.BlockSpec((None, nq, t_pad), lambda b: (b, 0, 0)),
        compiler_params=pltpu.CompilerParams(
            dimension_semantics=("parallel",)),
    )(pred_feat, tgt_feat_t)


def _linear_sum_assignment(cost):
    """Host-side assignment. Uses scipy (like the reference) when available; otherwise an
    exact brute-force search for tiny problems that handles both nq>=nt and nt>nq."""
    cost = np.asarray(cost, dtype=np.float64)
    if _scipy_lsa is not None:
        r, c = _scipy_lsa(cost)
        return np.asarray(r, np.int64), np.asarray(c, np.int64)
    nq, nt = cost.shape
    best_val, best = np.inf, None
    if nt <= nq:
        for perm in itertools.permutations(range(nq), nt):
            val = cost[list(perm), list(range(nt))].sum()
            if val < best_val:
                best_val, best = val, (list(perm), list(range(nt)))
    else:
        for perm in itertools.permutations(range(nt), nq):
            val = cost[list(range(nq)), list(perm)].sum()
            if val < best_val:
                best_val, best = val, (list(range(nq)), list(perm))
    rows = np.asarray(best[0], np.int64)
    cols = np.asarray(best[1], np.int64)
    order = np.argsort(rows)
    return rows[order], cols[order]


def hungarian_matcher(outputs, targets, targets_emb,
                      cost_class=COST_CLASS, cost_param=COST_PARAM,
                      cost_center=COST_CENTER, cost_emb=COST_EMB):
    bs, nq = outputs['pred_logits'].shape[:2]
    nc = outputs['pred_logits'].shape[-1]
    pd = outputs['pred_param'].shape[-1]
    cd = outputs['pred_center'].shape[-1]
    ed = outputs['pred_plane_embedding'].shape[-1]

    # Fused prediction features: one DMA per grid step instead of four tiny ones.
    pred_feat = jnp.concatenate(
        [outputs['pred_logits'], outputs['pred_param'],
         outputs['pred_center'], outputs['pred_plane_embedding']],
        axis=-1).astype(jnp.float32)                                   # [bs, nq, F]

    sizes = [int(t.shape[0]) for t in targets]
    t_pad = max(128, _round_up(max(sizes), 128))                       # lane-dense target axis

    # Fused, transposed, zero-padded target features: [bs, F, T_pad].
    tgt_blocks = []
    for b in range(bs):
        tgt = targets[b].astype(jnp.float32)
        temb = targets_emb[b].astype(jnp.float32)
        ids = tgt[:, 0].astype(jnp.int32)
        onehot_t = jax.nn.one_hot(ids, nc, dtype=jnp.float32).T        # [nc, T_b]
        block = jnp.concatenate(
            [onehot_t,
             jnp.transpose(tgt[:, 1:1 + pd]),
             jnp.transpose(tgt[:, 1 + pd:1 + pd + cd]),
             jnp.transpose(temb)], axis=0)                             # [F, T_b]
        block = jnp.pad(block, ((0, 0), (0, t_pad - sizes[b])))
        tgt_blocks.append(block)
    tgt_feat_t = jnp.stack(tgt_blocks, axis=0)                         # [bs, F, T_pad]

    C = compute_cost_matrix(pred_feat, tgt_feat_t, nc=nc, pd=pd, cd=cd, ed=ed,
                            w_class=cost_class, w_param=cost_param,
                            w_center=cost_center, w_emb=cost_emb)
    C = np.asarray(jax.block_until_ready(C))                           # [bs, nq, T_pad]

    # TODO(synk): linear_sum_assignment is an inherently sequential host-side algorithm
    # (scipy in the reference); it stays on host.
    res_indices = []
    for b in range(bs):
        rows, cols = _linear_sum_assignment(C[b, :, :sizes[b]])
        res_indices.append((rows, cols))
    return res_indices, C


def _reference_cost(outputs, targets, targets_emb):
    """Pure-numpy float64 reference of the PyTorch cost matrix (for verification)."""
    bs, nq, nc = outputs['pred_logits'].shape
    logits = np.asarray(outputs['pred_logits'], np.float64).reshape(bs * nq, nc)
    params = np.asarray(outputs['pred_param'], np.float64).reshape(bs * nq, -1)
    centers = np.asarray(outputs['pred_center'], np.float64).reshape(bs * nq, -1)
    embs = np.asarray(outputs['pred_plane_embedding'], np.float64).reshape(bs * nq, -1)
    prob = np.exp(logits - logits.max(-1, keepdims=True))
    prob /= prob.sum(-1, keepdims=True)
    tgt_all = np.concatenate([np.asarray(t, np.float64) for t in targets], axis=0)
    temb_all = np.concatenate([np.asarray(t, np.float64) for t in targets_emb], axis=0)
    ids = tgt_all[:, 0].astype(np.int64)
    cost_class = -prob[:, ids]
    cost_param = np.abs(params[:, :, None] - tgt_all[:, 1:4].T[None]).sum(1)
    cost_center = np.sqrt(((centers[:, :, None] - tgt_all[:, 4:6].T[None]) ** 2).sum(1))
    cost_emb = np.sqrt(((embs[:, :, None] - temb_all.T[None]) ** 2).sum(1))
    C = (COST_PARAM * cost_param + COST_CLASS * cost_class
         + COST_CENTER * cost_center + COST_EMB * cost_emb)
    return C.reshape(bs, nq, -1)


if __name__ == "__main__":
    key = jax.random.PRNGKey(0)
    bs, nq = 2, 8
    num_classes, param_dim, center_dim, emb_dim = 2, 3, 2, 8
    nts = [3, 4]  # targets per batch element

    ks = jax.random.split(key, 8)
    outputs = {
        'pred_logits': jax.random.normal(ks[0], (bs, nq, num_classes), jnp.float32),
        'pred_param': jax.random.normal(ks[1], (bs, nq, param_dim), jnp.float32),
        'pred_center': jax.random.uniform(ks[2], (bs, nq, center_dim), jnp.float32),
        'pred_plane_embedding': jax.random.normal(ks[3], (bs, nq, emb_dim), jnp.float32),
    }

    targets = []
    targets_emb = []
    for i, nt in enumerate(nts):
        kk = jax.random.split(ks[4 + i], 4)
        labels = jax.random.randint(kk[0], (nt, 1), 0, num_classes).astype(jnp.float32)
        tparams = jax.random.normal(kk[1], (nt, param_dim), jnp.float32)
        tcenters = jax.random.uniform(kk[2], (nt, center_dim), jnp.float32)
        targets.append(jnp.concatenate([labels, tparams, tcenters], axis=-1))  # [nt, 6]
        targets_emb.append(jax.random.normal(kk[3], (nt, emb_dim), jnp.float32))

    indices, C = hungarian_matcher(outputs, targets, targets_emb)

    # Structural checks (matches the module contract).
    assert C.shape[0] == bs and C.shape[1] == nq and C.shape[2] >= max(nts)
    for (rows, cols), nt in zip(indices, nts):
        assert len(rows) == len(cols) == min(nq, nt)

    # Numerical check of the Pallas cost matrix against a float64 reference
    # (bf16 MXU operands => generous but bug-catching tolerance).
    C_ref = _reference_cost(outputs, targets, targets_emb)
    offsets = np.cumsum([0] + nts)
    for b in range(bs):
        np.testing.assert_allclose(
            C[b, :, :nts[b]], C_ref[b, :, offsets[b]:offsets[b + 1]],
            rtol=2e-2, atol=5e-2)

    print("KERNEL_OK")
</pallas_src>

<mosaic_0001>
module attributes {stable_mosaic.version = 11 : i64} {
  func.func @_cost_kernel(%arg0: i32, %arg1: memref<1x8x15xf32, #tpu.memory_space<vmem>>, %arg2: memref<1x15x128xf32, #tpu.memory_space<vmem>>, %arg3: memref<1x8x128xf32, #tpu.memory_space<vmem>>) attributes {dimension_semantics = [#tpu.dimension_semantics<parallel>], iteration_bounds = array<i64: 2>, scalar_prefetch = 0 : i64, scratch_operands = 0 : i64, tpu.core_type = #tpu.core_type<tc>, window_params = [{transform_indices = @transform_0, window_bounds = array<i64: 1, 8, 15>}, {transform_indices = @transform_1, window_bounds = array<i64: 1, 15, 128>}, {transform_indices = @transform_2, window_bounds = array<i64: 1, 8, 128>}]} {
    %c0 = arith.constant 0 : index
    %c0_0 = arith.constant 0 : index
    %c0_1 = arith.constant 0 : index
    %0 = vector.load %arg1[%c0, %c0_0, %c0_1] : memref<1x8x15xf32, #tpu.memory_space<vmem>>, vector<1x8x2xf32>
    %1 = vector.shape_cast %0 : vector<1x8x2xf32> to vector<8x2xf32>
    %c0_2 = arith.constant 0 : index
    %c0_3 = arith.constant 0 : index
    %c2 = arith.constant 2 : index
    %2 = vector.load %arg1[%c0_2, %c0_3, %c2] : memref<1x8x15xf32, #tpu.memory_space<vmem>>, vector<1x8x3xf32>
    %3 = vector.shape_cast %2 : vector<1x8x3xf32> to vector<8x3xf32>
    %c0_4 = arith.constant 0 : index
    %c0_5 = arith.constant 0 : index
    %c5 = arith.constant 5 : index
    %4 = vector.load %arg1[%c0_4, %c0_5, %c5] : memref<1x8x15xf32, #tpu.memory_space<vmem>>, vector<1x8x2xf32>
    %5 = vector.shape_cast %4 : vector<1x8x2xf32> to vector<8x2xf32>
    %c0_6 = arith.constant 0 : index
    %c0_7 = arith.constant 0 : index
    %c7 = arith.constant 7 : index
    %6 = vector.load %arg1[%c0_6, %c0_7, %c7] : memref<1x8x15xf32, #tpu.memory_space<vmem>>, vector<1x8x8xf32>
    %7 = vector.shape_cast %6 : vector<1x8x8xf32> to vector<8x8xf32>
    %c0_8 = arith.constant 0 : index
    %c0_9 = arith.constant 0 : index
    %c0_10 = arith.constant 0 : index
    %8 = vector.load %arg2[%c0_8, %c0_9, %c0_10] : memref<1x15x128xf32, #tpu.memory_space<vmem>>, vector<1x2x128xf32>
    %9 = vector.shape_cast %8 : vector<1x2x128xf32> to vector<2x128xf32>
    %c0_11 = arith.constant 0 : index
    %c2_12 = arith.constant 2 : index
    %c0_13 = arith.constant 0 : index
    %10 = vector.load %arg2[%c0_11, %c2_12, %c0_13] : memref<1x15x128xf32, #tpu.memory_space<vmem>>, vector<1x3x128xf32>
    %11 = vector.shape_cast %10 : vector<1x3x128xf32> to vector<3x128xf32>
    %c0_14 = arith.constant 0 : index
    %c5_15 = arith.constant 5 : index
    %c0_16 = arith.constant 0 : index
    %12 = vector.load %arg2[%c0_14, %c5_15, %c0_16] : memref<1x15x128xf32, #tpu.memory_space<vmem>>, vector<1x2x128xf32>
    %13 = vector.shape_cast %12 : vector<1x2x128xf32> to vector<2x128xf32>
    %c0_17 = arith.constant 0 : index
    %c7_18 = arith.constant 7 : index
    %c0_19 = arith.constant 0 : index
    %14 = vector.load %arg2[%c0_17, %c7_18, %c0_19] : memref<1x15x128xf32, #tpu.memory_space<vmem>>, vector<1x8x128xf32>
    %15 = vector.shape_cast %14 : vector<1x8x128xf32> to vector<8x128xf32>
    %cst = arith.constant dense<0xFF800000> : vector<8xf32>
    %16 = vector.multi_reduction <maximumf>, %1, %cst [1] : vector<8x2xf32> to vector<8xf32>
    %17 = vector.shape_cast %16 : vector<8xf32> to vector<8x1xf32>
    %18 = vector.broadcast %17 : vector<8x1xf32> to vector<8x2xf32>
    %19 = arith.subf %1, %18 : vector<8x2xf32>
    %20 = math.exp %19 : vector<8x2xf32>
    %cst_20 = arith.constant dense<0.000000e+00> : vector<8xf32>
    %21 = vector.multi_reduction <add>, %20, %cst_20 [1] : vector<8x2xf32> to vector<8xf32>
    %22 = vector.shape_cast %21 : vector<8xf32> to vector<8x1xf32>
    %23 = vector.broadcast %22 : vector<8x1xf32> to vector<8x2xf32>
    %24 = arith.divf %20, %23 : vector<8x2xf32>
    %25 = arith.truncf %24 : vector<8x2xf32> to vector<8x2xbf16>
    %26 = arith.truncf %9 : vector<2x128xf32> to vector<2x128xbf16>
    %cst_21 = arith.constant dense<0.000000e+00> : vector<8x128xf32>
    %27 = tpu.matmul %25, %26, %cst_21 {dimension_numbers = #tpu.dot_dimension_numbers<[1], [0], [0], [1], [0, 0, 1, 1], [], []>} : vector<8x2xbf16>, vector<2x128xbf16>, vector<8x128xf32> -> vector<8x128xf32>
    %cst_22 = arith.constant -2.000000e+00 : f32
    %28 = vector.broadcast %cst_22 : f32 to vector<8x128xf32>
    %29 = arith.mulf %28, %27 : vector<8x128xf32>
    %30 = arith.mulf %7, %7 : vector<8x8xf32>
    %cst_23 = arith.constant dense<0.000000e+00> : vector<8xf32>
    %31 = vector.multi_reduction <add>, %30, %cst_23 [1] : vector<8x8xf32> to vector<8xf32>
    %32 = vector.shape_cast %31 : vector<8xf32> to vector<8x1xf32>
    %33 = arith.mulf %15, %15 : vector<8x128xf32>
    %cst_24 = arith.constant dense<0.000000e+00> : vector<128xf32>
    %34 = vector.multi_reduction <add>, %33, %cst_24 [0] : vector<8x128xf32> to vector<128xf32>
    %35 = vector.shape_cast %34 : vector<128xf32> to vector<1x128xf32>
    %36 = arith.truncf %7 : vector<8x8xf32> to vector<8x8xbf16>
    %37 = arith.truncf %15 : vector<8x128xf32> to vector<8x128xbf16>
    %cst_25 = arith.constant dense<0.000000e+00> : vector<8x128xf32>
    %38 = tpu.matmul %36, %37, %cst_25 {dimension_numbers = #tpu.dot_dimension_numbers<[1], [0], [0], [1], [0, 0, 1, 1], [], []>} : vector<8x8xbf16>, vector<8x128xbf16>, vector<8x128xf32> -> vector<8x128xf32>
    %39 = vector.broadcast %32 : vector<8x1xf32> to vector<8x128xf32>
    %40 = vector.broadcast %35 : vector<1x128xf32> to vector<8x128xf32>
    %41 = arith.addf %39, %40 : vector<8x128xf32>
    %cst_26 = arith.constant 2.000000e+00 : f32
    %42 = vector.broadcast %cst_26 : f32 to vector<8x128xf32>
    %43 = arith.mulf %42, %38 : vector<8x128xf32>
    %44 = arith.subf %41, %43 : vector<8x128xf32>
    %cst_27 = arith.constant 0.000000e+00 : f32
    %45 = vector.broadcast %cst_27 : f32 to vector<8x128xf32>
    %46 = arith.maximumf %44, %45 : vector<8x128xf32>
    %47 = math.sqrt %46 : vector<8x128xf32>
    %cst_28 = arith.constant 5.000000e-01 : f32
    %48 = vector.broadcast %cst_28 : f32 to vector<8x128xf32>
    %49 = arith.mulf %48, %47 : vector<8x128xf32>
    %50 = arith.addf %29, %49 : vector<8x128xf32>
    %cst_29 = arith.constant 0.000000e+00 : f32
    %51 = vector.broadcast %cst_29 : f32 to vector<8x128xf32>
    %52 = vector.extract_strided_slice %5 {offsets = [0, 0], sizes = [8, 1], strides = [1, 1]} : vector<8x2xf32> to vector<8x1xf32>
    %53 = vector.extract_strided_slice %13 {offsets = [0, 0], sizes = [1, 128], strides = [1, 1]} : vector<2x128xf32> to vector<1x128xf32>
    %54 = vector.broadcast %52 : vector<8x1xf32> to vector<8x128xf32>
    %55 = vector.broadcast %53 : vector<1x128xf32> to vector<8x128xf32>
    %56 = arith.subf %54, %55 : vector<8x128xf32>
    %57 = arith.mulf %56, %56 : vector<8x128xf32>
    %58 = arith.addf %51, %57 : vector<8x128xf32>
    %59 = vector.extract_strided_slice %5 {offsets = [0, 1], sizes = [8, 1], strides = [1, 1]} : vector<8x2xf32> to vector<8x1xf32>
    %60 = vector.extract_strided_slice %13 {offsets = [1, 0], sizes = [1, 128], strides = [1, 1]} : vector<2x128xf32> to vector<1x128xf32>
    %61 = vector.broadcast %59 : vector<8x1xf32> to vector<8x128xf32>
    %62 = vector.broadcast %60 : vector<1x128xf32> to vector<8x128xf32>
    %63 = arith.subf %61, %62 : vector<8x128xf32>
    %64 = arith.mulf %63, %63 : vector<8x128xf32>
    %65 = arith.addf %58, %64 : vector<8x128xf32>
    %66 = math.sqrt %65 : vector<8x128xf32>
    %cst_30 = arith.constant 2.000000e+00 : f32
    %67 = vector.broadcast %cst_30 : f32 to vector<8x128xf32>
    %68 = arith.mulf %67, %66 : vector<8x128xf32>
    %69 = arith.addf %50, %68 : vector<8x128xf32>
    %70 = vector.extract_strided_slice %3 {offsets = [0, 0], sizes = [8, 1], strides = [1, 1]} : vector<8x3xf32> to vector<8x1xf32>
    %71 = vector.extract_strided_slice %11 {offsets = [0, 0], sizes = [1, 128], strides = [1, 1]} : vector<3x128xf32> to vector<1x128xf32>
    %72 = vector.broadcast %70 : vector<8x1xf32> to vector<8x128xf32>
    %73 = vector.broadcast %71 : vector<1x128xf32> to vector<8x128xf32>
    %74 = arith.subf %72, %73 : vector<8x128xf32>
    %75 = math.absf %74 : vector<8x128xf32>
    %cst_31 = arith.constant 1.000000e+00 : f32
    %76 = vector.broadcast %cst_31 : f32 to vector<8x128xf32>
    %77 = arith.mulf %76, %75 : vector<8x128xf32>
    %78 = arith.addf %69, %77 : vector<8x128xf32>
    %79 = vector.extract_strided_slice %3 {offsets = [0, 1], sizes = [8, 1], strides = [1, 1]} : vector<8x3xf32> to vector<8x1xf32>
    %80 = vector.extract_strided_slice %11 {offsets = [1, 0], sizes = [1, 128], strides = [1, 1]} : vector<3x128xf32> to vector<1x128xf32>
    %81 = vector.broadcast %79 : vector<8x1xf32> to vector<8x128xf32>
    %82 = vector.broadcast %80 : vector<1x128xf32> to vector<8x128xf32>
    %83 = arith.subf %81, %82 : vector<8x128xf32>
    %84 = math.absf %83 : vector<8x128xf32>
    %cst_32 = arith.constant 1.000000e+00 : f32
    %85 = vector.broadcast %cst_32 : f32 to vector<8x128xf32>
    %86 = arith.mulf %85, %84 : vector<8x128xf32>
    %87 = arith.addf %78, %86 : vector<8x128xf32>
    %88 = vector.extract_strided_slice %3 {offsets = [0, 2], sizes = [8, 1], strides = [1, 1]} : vector<8x3xf32> to vector<8x1xf32>
    %89 = vector.extract_strided_slice %11 {offsets = [2, 0], sizes = [1, 128], strides = [1, 1]} : vector<3x128xf32> to vector<1x128xf32>
    %90 = vector.broadcast %88 : vector<8x1xf32> to vector<8x128xf32>
    %91 = vector.broadcast %89 : vector<1x128xf32> to vector<8x128xf32>
    %92 = arith.subf %90, %91 : vector<8x128xf32>
    %93 = math.absf %92 : vector<8x128xf32>
    %cst_33 = arith.constant 1.000000e+00 : f32
    %94 = vector.broadcast %cst_33 : f32 to vector<8x128xf32>
    %95 = arith.mulf %94, %93 : vector<8x128xf32>
    %96 = arith.addf %87, %95 : vector<8x128xf32>
    %c0_34 = arith.constant 0 : index
    %c0_35 = arith.constant 0 : index
    %c0_36 = arith.constant 0 : index
    %97 = vector.load %arg3[%c0_34, %c0_35, %c0_36] : memref<1x8x128xf32, #tpu.memory_space<vmem>>, vector<1x8x128xf32>
    %98 = vector.shape_cast %97 : vector<1x8x128xf32> to vector<8x128xf32>
    %99 = vector.shape_cast %96 : vector<8x128xf32> to vector<1x8x128xf32>
    tpu.vector_store %arg3[%c0_34, %c0_35, %c0_36], %99 {strides = array<i32>} : memref<1x8x128xf32, #tpu.memory_space<vmem>>, vector<1x8x128xf32>,
    return
  }
  func.func @transform_0(%arg0: i32) -> (i32, i32, i32) {
    %c0_i32 = arith.constant 0 : i32
    %c0_i32_0 = arith.constant 0 : i32
    %c0_i32_1 = arith.constant 0 : i32
    return %arg0, %c0_i32, %c0_i32_0 : i32, i32, i32
  }
  func.func @transform_1(%arg0: i32) -> (i32, i32, i32) {
    %c0_i32 = arith.constant 0 : i32
    %c0_i32_0 = arith.constant 0 : i32
    %c0_i32_1 = arith.constant 0 : i32
    return %arg0, %c0_i32, %c0_i32_0 : i32, i32, i32
  }
  func.func @transform_2(%arg0: i32) -> (i32, i32, i32) {
    %c0_i32 = arith.constant 0 : i32
    %c0_i32_0 = arith.constant 0 : i32
    %c0_i32_1 = arith.constant 0 : i32
    return %arg0, %c0_i32, %c0_i32_0 : i32, i32, i32
  }
}

</mosaic_0001>

<bundles_post_ra>
// kernel: tpu_custom_call.1
= control target key start
LH: loop header
LB: loop body
LE: loop exit
PB: predicated region body
PF: predicated region fallthrough
CT: control target
= control target key end

     0   :  { %7 = vsyncpa [#allocation3], 0  ;;  %s751_s0 = inlined_call_operand.vmem [shape: f32[2,8,15], index: 0, kind: input, shape index: {}]   ;;  %s752_s1 = inlined_call_operand.vmem [shape: f32[2,15,128], index: 1, kind: input, shape index: {}]   ;;  %s753_s2 = inlined_call_operand.hbm [shape: f32[2,8,128], index: 2, kind: output, shape index: {}]  }
   0x1   :  { %9 = vsyncpa [#allocation3 + $0x1], 0  ;;  %s639_s9 = smov 0   ;;  %s641_s10 = smov 0  }
   0x2   :  { %s643_s11 = smov 0   ;;  %s645_s12 = smov 0  }
   0x3 LB: > { %s660_s13 = sadd.s32 4294967295, %s613_s12   ;;  %s459_s14 = sadd.s32 4294967294, %s613_s12   ;;  %s613_s12 = sphi %s645_s12, %s759_s12   ;;  %s609_s11 = sphi %s643_s11, %s758_s11   ;;  %s605_s10 = sphi %s641_s10, %s757_s10   ;;  %s601_s9 = sphi %s639_s9, %s756_s9  }
   0x4   : > { %s664_s15 = sadd.s32 1, %s613_s12   ;;  %s74_s16 = sadd.s32 1, %s609_s11 }
   0x5   : > { %s71_s17 = ssub.s32 %s613_s12, %s664_s15  ;;  %p84_p0 = scmp.ne.s32.totalorder %s609_s11, %s605_s10 }
   0x6   : > { %p72_p1 = scmp.eq.s32.totalorder %s71_s17, 0  ;;  %p85_p2 = scmp.eq.s32.totalorder %s660_s13, 1 }
   0x7   : > { %p90_p3 = scmp.ne.s32.totalorder %s605_s10, %s601_s9  ;;  %p91_p4 = scmp.eq.s32.totalorder %s459_s14, 1 }
   0x8   : > { %s675_s18 = scalar_select %p72_p1, %s609_s11, %s74_s16  }
   0x9   : > { %p677_p5 = por %p85_p2, %p84_p0  ;;  %p681_p6 = por %p91_p4, %p90_p3 }
   0xa   : > { %p462_p7 = scmp.ge.s32.totalorder %s613_s12, 1  ;;  %p124_p8 = scmp.lt.s32.totalorder %s613_s12, 3 }
   0xc   : > { %p125_p9 = pnand %p462_p7, %p124_p8 }
   0xd   : > { %p150_p10 = scmp.lt.s32.totalorder (!%p125_p9), %s660_s13, 1  ;;  %vm165_vm0 = vcmask (!%p125_p9), 15360   ;;  %v615_v3 = vmov (!%p125_p9), 0.0   ;;  %s616_s30 = smov (!%p125_p9), 121   ;;  %vm251_vm1 = vcmask (!%p125_p9), 1043456   ;;  %vm617_vm2 = vmmov (!%p125_p9), 0  }
   0xe   : > { %128 = sbr.rel (%p125_p9) target bundleno = 580 (0x244), region = 28  ;;  %484 = vmatprep.subr.bf16.mxu1 (!%p125_p9), %v615_v3  ;;  %478 = vmatprep.subr.bf16.mxu0 (!%p125_p9), %v615_v3  ;;  %vm232_vm3 = vcmask (!%p125_p9), 64512   ;;  %vm182_vm4 = vcmask (!%p125_p9), 1040384   ;;  %v618_v19 = vmov (!%p125_p9), 6   ;;  %v619_v20 = vmov (!%p125_p9), 5   ;;  %s147_s3 = sand.u32 (!%p125_p9), 1, %s605_s10  }
   0xf   : > { %486 = vmatprep.mubr.msk.bf16.mxu1 (!%p125_p9), %vm617_vm2, %v615_v3  ;;  %480 = vmatprep.mubr.msk.bf16.mxu0 (!%p125_p9), %vm617_vm2, %v615_v3  ;;  %v620_v21 = vmov (!%p125_p9), 2   ;;  %v621_v22 = vmov (!%p125_p9), 3   ;;  %v622_v23 = vmov (!%p125_p9), 4   ;;  %v313_v43 = vlaneseq (!%p125_p9)  ;;  %s463_s4 = sshll.u32 (!%p125_p9), %s147_s3, 3  ;;  %s470_s5 = sshll.u32 (!%p125_p9), %s660_s13, 7 }
  0x10   : > { %538 = vset.pattern.permute.xlu0 (!%p125_p9), %v618_v19  ;;  %537 = vset.pattern.permute.xlu1 (!%p125_p9), %v619_v20  ;;  %s149_s6 = scalar_lea.vmem (!%p125_p9), [#allocation2], %s463_s4  ;;  %s709_s16 = scalar_lea.hbm (!%p125_p9), %s753_s2, %s470_s5 }
  0x11   : > { %v314_v44 = vshrl.u32 (!%p125_p9), %v313_v43, 7  ;;  %s388_s7 = sshll.u32 (!%p125_p9), %s149_s6, 4  ;;  %s375_s17 = scalar_lea.sflag (!%p125_p9), [#allocation3], %s147_s3  ;;  %s711_s7 = int_to_ptr.vmem [resolvable:$true] %s388_s7 }
  0x13   : > { %v315_v45 = vsub.s32 (!%p125_p9), 0, %v314_v44  ;;  %v326_v46 = vsub.s32 (!%p125_p9), 1, %v314_v44  ;;  %v368_v3 = vsub.s32 (!%p125_p9), 2, %v314_v44 }
  0x15   : > { %s151_s21 = scalar_select %p150_p10, %s660_s13, 1 }
  0x16   : > { %s623_s13 = smov [#allocation2]  }
  0x17   : > { %s464_s22 = sshll.u32 %s151_s21, 3  ;;  %s473_s26 = sshll.u32 %s151_s21, 4 }
  0x18   : > { %s153_s25 = scalar_lea.vmem %s751_s0, %s464_s22  ;;  %s696_s29 = scalar_lea.vmem %s752_s1, %s473_s26 }
  0x19   : > { %v160_v0 = vld [vmem:[%s153_s25] sm:$0xff]  ;;  %s551_s21 = scalar_lea.vmem %s711_s7, 128  ;;  %s555_s22 = sshll.u32 %s623_s13, 4  ;;  %s556_s22 = int_to_ptr.vmem [resolvable:$false] %s555_s22 }
  0x1a   : > { %v166_v1 = vsel %vm165_vm0, %v160_v0, -inf  ;;  %v243_v2 = vpack.c.bf16 %v160_v0, %v160_v0  ;;  %v227_v4 = vmul.f32 %v160_v0, %v160_v0  ;;  %v164_v5 = vld [vmem:[%s696_s29 + $0x7] sm:$0xff]  ;;  %v161_v14 = vld [vmem:[%s696_s29] sm:$0x3]  ;;  %v163_v47 = vld [vmem:[%s696_s29 + $0x5] sm:$0x3]  ;;  %p552_p11 = scmp.ne.s32.totalorder %s711_s7, %s551_s21  ;;  %p558_p0 = scmp.lt.s32.totalorder %s711_s7, %s556_s22 }
  0x1b   : > { %167 = vmax.xlane.f32.xlu0 %v166_v1  ;;  %v244_v6 = vpack.c.bf16 %v164_v5, %v164_v5  ;;  %v178_v15 = vpack.c.bf16 %v161_v14, %v161_v14  ;;  %v236_v28 = vmul.f32 %v164_v5, %v164_v5  ;;  %v316_v48 = vrot.slane %v163_v47, %v315_v45  ;;  %v162_v63 = vld [vmem:[%s696_s29 + $0x2] sm:$0x7]  ;;  %s557_s23 = scalar_lea.vmem %s556_s22, 256 }
  0x1c   : > { %246 = vrot.lane.b32.xlu1 %v243_v2, %s616_s30  ;;  %v327_v49 = vrot.slane %v163_v47, %v326_v46  ;;  %v347_v5 = vrot.slane %v162_v63, %v315_v45  ;;  %p553_p12 = pnand %p552_p11, %p677_p5  ;;  %p559_p1 = scmp.lt.s32.totalorder %s557_s23, %s551_s21 }
  0x1d   : > { %v253_v7 = vsel %vm251_vm1, %v244_v6, 0  ;;  %v184_v16 = vsel %vm182_vm4, %v178_v15, 0  ;;  %v237_v29 = vrot.slane %v236_v28, 4 }
  0x1e   : > { %485 = vmatpush3.bf16.msra.mxu1 %v253_v7  ;;  %479 = vmatpush3.bf16.msra.mxu0 %v184_v16  ;;  %p554_p13 = pneg %p553_p12  ;;  %p560_p2 = por %p559_p1, %p558_p0 }
  0x1f   : > { %v238_v30 = vadd.f32 %v237_v29, %v236_v28 }
  0x20   : > { %229 = vrot.lane.b32.xlu1 %v227_v4, %s616_s30  ;;  %p561_p3 = pnand %p560_p2, %p554_p13 }
  0x21   : > { %v239_v31 = vrot.slane %v238_v30, 2 }
  0x23   : > { %v240_v32 = vadd.f32 %v239_v31, %v238_v30 }
  0x24   : > { %310 = vperm.xlu1 %537, %v160_v0  }
  0x25   : > { %v241_v33 = vrot.slane %v240_v32, 1 }
  0x27   : > { %v242_v34 = vadd.f32 %v241_v33, %v240_v32 }
  0x28   : > { %539 = vset.pattern.permute.xlu1 %v620_v21 }
  0x29   : > { %341 = vperm.xlu1 %539, %v160_v0  }
  0x2d   : > { %540 = vset.pattern.permute.xlu1 %v621_v22 }
  0x2e   : > { %352 = vperm.xlu1 %540, %v160_v0  }
  0x32   : > { %541 = vset.pattern.permute.xlu1 %v622_v23 }
  0x33   : > { %363 = vperm.xlu1 %541, %v160_v0  }
  0x8e   : > { %v247_v11 = vpop.permute.xlu1 %246 }
  0x8f   : > { %487 = vmatmul.mubr.msk.bf16.vlgmr.msra.gmra.mrb[0].mxu1 %vm232_vm3, %v247_v11 }
  0x92   : > { %v230_v17 = vpop.permute.xlu1 %229 }
  0x93   : > { %v233_v18 = vsel %vm232_vm3, %v230_v17, 0.0 }
  0xa3   : > { %v311_v50 = vpop.permute.xlu1 %310 }
  0xa4   : > { %v317_v52 = vsub.f32 %v311_v50, %v316_v48 }
  0xa6   : > { %v318_v54 = vmul.f32 %v317_v52, %v317_v52 }
  0xa8   : > { %v168_v8 = vpop.xlane.xlu0 %167  ;;  %v342_v59 = vpop.permute.xlu1 %341 }
  0xa9   : > { %v169_v9 = vsub.f32 %v160_v0, %v168_v8  ;;  %v358_v8 = vrot.slane %v162_v63, %v326_v46 }
  0xab   : > { %v170_v10 = vmul.f32 1.442695, %v169_v9  ;;  %v369_v9 = vrot.slane %v162_v63, %v368_v3 }
  0xad   : > { %543 = vpow2.f32 %v170_v10  ;;  %v353_v1 = vpop.permute.xlu1 %352 }
  0xae   : > { %v359_v20 = vsub.f32 %v353_v1, %v358_v8 }
  0xb7   : > { %v544_v12 = vpop.eup %543 }
  0xb8   : > { %v172_v13 = vsel %vm165_vm0, %v544_v12, 0.0 }
  0xb9   : > { %173 = vadd.xlane.f32.xlu0 %v172_v13  ;;  %v348_v13 = vsub.f32 %v342_v59, %v347_v5 }
  0xbd   : > { %234 = vadd.xlane.f32.xlu0 %v233_v18 }
  0xd3   : > { %321 = vperm.xlu0 %538, %v160_v0  }
  0xd7   : > { %542 = vset.pattern.permute.xlu0 %v622_v23  ;;  %v349_v23 = vand.u32 2147483647, %v348_v13 }
 0x146   : > { %v174_v24 = vpop.xlane.xlu0 %173 }
 0x147   : > { %545 = vrcp.f32 %v174_v24 }
 0x14a   : > { %v235_v35 = vpop.xlane.xlu0 %234 }
 0x14b   : > { %v295_v36 = vadd.f32 %v242_v34, %v235_v35 }
 0x151   : > { %v546_v25 = vpop.eup %545 }
 0x152   : > { %v176_v26 = vmul.f32 %v546_v25, %v544_v12  ;;  %v322_v51 = vpop.permute.xlu0 %321  ;;  %v364_v12 = vpop.permute.xlu1 %363 }
 0x153   : > { %v328_v53 = vsub.f32 %v322_v51, %v327_v49  ;;  %v370_v22 = vsub.f32 %v364_v12, %v369_v9 }
 0x154   : > { %v177_v27 = vpack.c.bf16 %v176_v26, %v176_v26  ;;  %v360_v26 = vand.u32 2147483647, %v359_v20 }
 0x155   : > { %v329_v55 = vmul.f32 %v328_v53, %v328_v53 }
 0x156   : > { %481 = vmatmul.mubr.msk.bf16.vlgmr.msra.gmra.mrb[0].mxu0 %vm165_vm0, %v177_v27  ;;  %v371_v27 = vand.u32 2147483647, %v370_v22 }
 0x157   : > { %v330_v57 = vadd.f32 %v329_v55, %v318_v54 }
 0x159   : > { %vm333_vm6 = vcmp.eq.f32.partialorder %v330_v57, inf  ;;  %v336_v4 = vand.u32 2147483648, %v330_v57  ;;  %vm335_vm8 = vcmp.eq.f32.partialorder %v330_v57, 0.0 }
 0x162   : > { %v289_v37 = vpop.f32.mrb[0].mxu1 }
 0x163   : > { %v296_v38 = vmul.f32 2.0, %v289_v37  ;;  %v488_v39 = vpop.f32.mrb[1].mxu1 }
 0x164   : > { %v292_v40 = vpop.f32.mrb[2].mxu1 }
 0x165   : > { %v297_v41 = vsub.f32 %v295_v36, %v296_v38  ;;  %v489_v42 = vpop.f32.mrb[3].mxu1 }
 0x167   : > { %v298_v56 = vmax.f32 %v297_v41, 0.0 }
 0x169   : > { %547 = vrsqrt.f32 %v298_v56  ;;  %vm301_vm5 = vcmp.eq.f32.partialorder %v298_v56, inf  ;;  %v304_v0 = vand.u32 2147483648, %v298_v56  ;;  %vm303_vm7 = vcmp.eq.f32.partialorder %v298_v56, 0.0 }
 0x16a   : > { %549 = vrsqrt.f32 %v330_v57 }
 0x173   : > { %v548_v58 = vpop.eup %547 }
 0x174   : > { %v550_v60 = vpop.eup %549  ;;  %v300_v61 = vmul.f32 %v548_v58, %v298_v56 }
 0x175   : > { %v332_v62 = vmul.f32 %v550_v60, %v330_v57 }
 0x176   : > { %v302_v2 = vsel %vm301_vm5, %v298_v56, %v300_v61 }
 0x177   : > { %v334_v6 = vsel %vm333_vm6, %v330_v57, %v332_v62  ;;  %v305_v7 = vsel %vm303_vm7, %v304_v0, %v302_v2 }
 0x178   : > { %v337_v11 = vsel %vm335_vm8, %v336_v4, %v334_v6  ;;  %v306_v15 = vmul.f32 0.5, %v305_v7 }
 0x179   : > { %v338_v19 = vmul.f32 2.0, %v337_v11 }
 0x229   : > { %v220_v10 = vpop.f32.mrb[0].mxu0 }
 0x22a   : > { %v226_v14 = vmul.f32 -2.0, %v220_v10  ;;  %v482_v16 = vpop.f32.mrb[1].mxu0 }
 0x22b   : > { %v223_v17 = vpop.f32.mrb[2].mxu0 }
 0x22c   : > { %v307_v18 = vadd.f32 %v306_v15, %v226_v14  ;;  %v483_v21 = vpop.f32.mrb[3].mxu0 }
 0x22e   : > { %v339_v24 = vadd.f32 %v338_v19, %v307_v18 }
 0x230   : > { %v350_v25 = vadd.f32 %v349_v23, %v339_v24 }
 0x232   : > { %v361_v28 = vadd.f32 %v360_v26, %v350_v25 }
 0x234   : > { %v372_v29 = vadd.f32 %v371_v27, %v361_v28 }
 0x236   : > { %373 = vst [vmem:[%s149_s6] sm:$0xff] %v372_v29 }
 0x237   : > { %564 = shalt.err (!%p561_p3)
}
 0x238   : > { %s565_s24 = scalar_lea.hbm %s709_s16, 128  ;;  %s569_s27 = scalar_lea.hbm %s753_s2, 256 }
 0x239   : > { %p566_p4 = scmp.ne.s32.totalorder %s709_s16, %s565_s24  ;;  %p570_p9 = scmp.lt.u32.totalorder %s709_s16, %s753_s2 }
 0x23a   : > { %p571_p10 = scmp.lt.u32.totalorder %s569_s27, %s565_s24  ;;  %p573_p12 = scmp.lt.u32.totalorder %s565_s24, %s709_s16 }
 0x23b   : > { %p567_p7 = pnand %p566_p4, %p677_p5 }
 0x23c   : > { %p572_p11 = por %p571_p10, %p570_p9 }
 0x23d   : > { %p568_p8 = pneg %p567_p7 }
 0x23e   : > { %p574_p13 = por %p573_p12, %p572_p11 }
 0x240   : > { %p575_p0 = pnand %p574_p13, %p568_p8 }
 0x242   : > { %578 = shalt.err (!%p575_p0)
}
 0x243   : > { %490 = dma.vmem_to_hbm [thread:$0]  (%p677_p5), %s711_s7, 128, %s709_s16, %s375_s17  }
 0x244 PF: > { %p496_p1 = scmp.ge.s32.totalorder %s613_s12, 2  ;;  %s400_s30 = sand.u32 1, %s601_s9  }
 0x245   : > { %s401_s3 = scalar_lea.sflag [#allocation3], %s400_s30 }
 0x246   : > { %p493_p2 = pnand %p496_p1, %p681_p6 }
 0x248   : > { %596 = dma.done.wait (!%p493_p2), %s401_s3, 128  }
 0x249   : > { %598 = vsyncadd (!%p493_p2), %s401_s3, 4294967168  ;;  %p12_p3 = scmp.ge.s32.totalorder %s664_s15, 4   ;;  %s756_s9 = smov %s605_s10 }
 0x24a   : > { %s757_s10 = smov %s609_s11  ;;  %s758_s11 = smov %s675_s18 }
 0x24b   : > { %s759_s12 = smov %s664_s15  ;;  %14 = sbr.rel (!%p12_p3) target bundleno = 3 (0x3), region = 66 }
 0x252   :  { %406 = vsyncpa [#allocation3], 1 }
 0x253   :  { %408 = vsyncpa [#allocation3 + $0x1], 1 }

</bundles_post_ra>
